<compile_context>
chip_gen: v5e
topology: v5e:2x2
jax: 0.10.0
libtpu: 0.0.40
codegen_flags: <defaults>
</compile_context>

<pallas_src>
import math
import functools

import jax
import jax.numpy as jnp
import numpy as np
from jax.experimental import pallas as pl
from jax.experimental.pallas import tpu as pltpu


def make_pe_table(d_model: int, max_len: int) -> jnp.ndarray:
    """Deterministic positional-encoding buffer, same recipe as the torch module."""
    position = jnp.arange(max_len, dtype=jnp.float32)[:, None]                 # [max_len, 1]
    div_term = jnp.exp(
        jnp.arange(0, d_model, 2, dtype=jnp.float32) * (-math.log(10000.0) / d_model)
    )                                                                          # [d_model/2]
    pe = jnp.zeros((max_len, d_model), jnp.float32)
    pe = pe.at[:, 0::2].set(jnp.sin(position * div_term))
    pe = pe.at[:, 1::2].set(jnp.cos(position * div_term))
    return pe                                                                  # [max_len, d_model]


def _pe_eval_kernel(x_ref, pe_ref, o_ref):
    # x_ref: (TS, B*D), pe_ref: (1, B*D) -> broadcast over rows.
    o_ref[...] = (x_ref[...] + pe_ref[...]).astype(o_ref.dtype)


def _pe_train_kernel(x_ref, pe_ref, bits_ref, o_ref, *, threshold: int, scale: float):
    # Inverted dropout with an integer threshold: keep iff bits >= p * 2^32.
    val = x_ref[...] + pe_ref[...]
    keep = bits_ref[...] >= jnp.uint32(threshold)
    o_ref[...] = jnp.where(keep, val * jnp.float32(scale), jnp.float32(0.0)).astype(o_ref.dtype)


def _choose_rows_per_block(S: int, row_bytes: int, target_bytes: int = 1 << 20) -> int:
    """Rows-per-block so each block is ~1 MiB, multiple of 8 (or the full S)."""
    ts = max(1, target_bytes // max(row_bytes, 1))
    if ts >= S:
        return S                     # single block: full dim satisfies (8,128) rule
    if ts < 8:
        return min(S, 8)
    return (ts // 8) * 8


def positional_encoding(x, pe_table, *, p: float = 0.1, train: bool = False, key=None):
    """x: [S, B, D] float32; pe_table: [max_len, D]. Returns [S, B, D]."""
    S, B, D = x.shape
    BD = B * D
    # Mirrors torch: pe[:, :x.size(1)] -> [B, D], broadcast over sequence axis.
    pe2 = pe_table[:B].reshape(1, BD).astype(jnp.float32)
    x2 = x.reshape(S, BD)

    ts = _choose_rows_per_block(S, BD * x2.dtype.itemsize)
    grid = (pl.cdiv(S, ts),)
    x_spec = pl.BlockSpec((ts, BD), lambda i: (i, 0))
    pe_spec = pl.BlockSpec((1, BD), lambda i: (0, 0))       # resident, re-used every step
    bits_spec = pl.BlockSpec((ts, BD), lambda i: (i, 0))
    out_spec = pl.BlockSpec((ts, BD), lambda i: (i, 0))
    cparams = pltpu.CompilerParams(dimension_semantics=("parallel",))

    use_dropout = train and p > 0.0
    if use_dropout and p >= 1.0:
        return jnp.zeros_like(x)

    if not use_dropout:
        out2 = pl.pallas_call(
            _pe_eval_kernel,
            grid=grid,
            in_specs=[x_spec, pe_spec],
            out_specs=out_spec,
            out_shape=jax.ShapeDtypeStruct((S, BD), x.dtype),
            compiler_params=cparams,
        )(x2, pe2)
    else:
        if key is None:
            key = jax.random.PRNGKey(0)
        bits = jax.random.bits(key, (S, BD), dtype=jnp.uint32)
        threshold = min(int(round(p * (2.0 ** 32))), 2 ** 32 - 1)
        kernel = functools.partial(
            _pe_train_kernel, threshold=threshold, scale=1.0 / (1.0 - p)
        )
        out2 = pl.pallas_call(
            kernel,
            grid=grid,
            in_specs=[x_spec, pe_spec, bits_spec],
            out_specs=out_spec,
            out_shape=jax.ShapeDtypeStruct((S, BD), x.dtype),
            compiler_params=cparams,
        )(x2, pe2, bits)

    return out2.reshape(S, B, D)


if __name__ == "__main__":
    D_MODEL = 32
    MAX_LEN = 64
    SEQ_LEN = 8
    BATCH = 4
    P = 0.1

    key = jax.random.PRNGKey(0)
    kx, kd = jax.random.split(key)
    x = jax.random.normal(kx, (SEQ_LEN, BATCH, D_MODEL), dtype=jnp.float32)
    pe_table = make_pe_table(D_MODEL, MAX_LEN)

    # Eval mode (dropout = identity): exact check against the reference math.
    out_eval = jax.block_until_ready(positional_encoding(x, pe_table, p=P, train=False))
    ref_eval = x + pe_table[:BATCH][None, :, :]
    np.testing.assert_allclose(np.asarray(out_eval), np.asarray(ref_eval), rtol=1e-6, atol=1e-6)

    # Train mode: deterministic given the key -> regenerate the same bits and check exactly.
    out_train = jax.block_until_ready(
        positional_encoding(x, pe_table, p=P, train=True, key=kd)
    )
    bits_ref = jax.random.bits(kd, (SEQ_LEN, BATCH * D_MODEL), dtype=jnp.uint32).reshape(
        SEQ_LEN, BATCH, D_MODEL
    )
    thr = jnp.uint32(min(int(round(P * (2.0 ** 32))), 2 ** 32 - 1))
    ref_train = jnp.where(bits_ref >= thr, ref_eval * jnp.float32(1.0 / (1.0 - P)), 0.0)
    np.testing.assert_allclose(np.asarray(out_train), np.asarray(ref_train), rtol=1e-6, atol=1e-6)

    print("KERNEL_OK")
</pallas_src>

<mosaic_0001>
module attributes {stable_mosaic.version = 11 : i64} {
  func.func @_pe_eval_kernel(%arg0: i32, %arg1: memref<8x128xf32, #tpu.memory_space<vmem>>, %arg2: memref<1x128xf32, #tpu.memory_space<vmem>>, %arg3: memref<8x128xf32, #tpu.memory_space<vmem>>) attributes {dimension_semantics = [#tpu.dimension_semantics<parallel>], iteration_bounds = array<i64: 1>, scalar_prefetch = 0 : i64, scratch_operands = 0 : i64, tpu.core_type = #tpu.core_type<tc>, window_params = [{transform_indices = @transform_0, window_bounds = array<i64: 8, 128>}, {pipeline_mode = #tpu.pipeline_mode<synchronous>, transform_indices = @transform_1, window_bounds = array<i64: 1, 128>}, {transform_indices = @transform_2, window_bounds = array<i64: 8, 128>}]} {
    %c0 = arith.constant 0 : index
    %c0_0 = arith.constant 0 : index
    %0 = vector.load %arg1[%c0, %c0_0] : memref<8x128xf32, #tpu.memory_space<vmem>>, vector<8x128xf32>
    %c0_1 = arith.constant 0 : index
    %c0_2 = arith.constant 0 : index
    %1 = vector.load %arg2[%c0_1, %c0_2] : memref<1x128xf32, #tpu.memory_space<vmem>>, vector<1x128xf32>
    %2 = vector.broadcast %1 : vector<1x128xf32> to vector<8x128xf32>
    %3 = arith.addf %0, %2 : vector<8x128xf32>
    %c0_3 = arith.constant 0 : index
    %c0_4 = arith.constant 0 : index
    %4 = vector.load %arg3[%c0_3, %c0_4] : memref<8x128xf32, #tpu.memory_space<vmem>>, vector<8x128xf32>
    tpu.vector_store %arg3[%c0_3, %c0_4], %3 {strides = array<i32>} : memref<8x128xf32, #tpu.memory_space<vmem>>, vector<8x128xf32>,
    return
  }
  func.func @transform_0(%arg0: i32) -> (i32, i32) {
    %c0_i32 = arith.constant 0 : i32
    %c0_i32_0 = arith.constant 0 : i32
    return %arg0, %c0_i32 : i32, i32
  }
  func.func @transform_1(%arg0: i32) -> (i32, i32) {
    %c0_i32 = arith.constant 0 : i32
    %c0_i32_0 = arith.constant 0 : i32
    %c0_i32_1 = arith.constant 0 : i32
    return %c0_i32, %c0_i32_0 : i32, i32
  }
  func.func @transform_2(%arg0: i32) -> (i32, i32) {
    %c0_i32 = arith.constant 0 : i32
    %c0_i32_0 = arith.constant 0 : i32
    return %arg0, %c0_i32 : i32, i32
  }
}

</mosaic_0001>

<bundles_post_ra>
// kernel: tpu_custom_call.1
= control target key start
LH: loop header
LB: loop body
LE: loop exit
PB: predicated region body
PF: predicated region fallthrough
CT: control target
= control target key end

     0   :  { %7 = vsyncpa [#allocation3], 0  ;;  %s174_s0 = inlined_call_operand.hbm [shape: f32[8,128], index: 0, kind: input, shape index: {}]   ;;  %s175_s1 = inlined_call_operand.hbm [shape: f32[1,128], index: 1, kind: input, shape index: {}]   ;;  %s176_s2 = inlined_call_operand.hbm [shape: f32[8,128], index: 2, kind: output, shape index: {}]  }
   0x1   :  { %8 = vsyncpa [#allocation6], 0 }
   0x2   :  { %9 = vsyncpa [#allocation4], 0  ;;  %s15_s11 = sshll.u32 %s174_s0, 4  ;;  %s147_s12 = smov [#allocation2]   ;;  %s16_s11 = int_to_ptr.hbm [resolvable:$true] %s15_s11 }
   0x3   :  { %s17_s13 = sshll.u32 %s147_s12, 4  ;;  %s26_s16 = sshll.u32 %s175_s1, 4  ;;  %s18_s13 = int_to_ptr.vmem [resolvable:$true] %s17_s13  ;;  %s27_s16 = int_to_ptr.hbm [resolvable:$true] %s26_s16 }
   0x4   :  { %20 = dma.hbm_to_vmem [thread:$0]  %s16_s11, 128, %s18_s13, [#allocation3]  }
   0x5   :  { %s148_s17 = smov [#allocation5]  }
   0x6   :  { %s28_s18 = sshll.u32 %s148_s17, 4  ;;  %s29_s18 = int_to_ptr.vmem [resolvable:$true] %s28_s18 }
   0x7   :  { %31 = dma.hbm_to_vmem [thread:$0]  %s27_s16, 16, %s29_s18, [#allocation6]  }
   0x8   :  { %141 = dma.done.wait [#allocation3], 128  }
   0x9   :  { %142 = vsyncadd [#allocation3], 4294967168 }
   0xa   :  { %143 = dma.done.wait [#allocation6], 16  }
   0xb   :  { %144 = vsyncadd [#allocation6], 4294967280  ;;  %s149_s19 = smov [#allocation7]   ;;  %s54_s22 = sshll.u32 %s176_s2, 4  ;;  %v40_v0 = vld [vmem:[#allocation2] sm:$0xff]  ;;  %s55_s22 = int_to_ptr.hbm [resolvable:$true] %s54_s22 }
   0xc   :  { %s52_s0 = sshll.u32 %s149_s19, 4  ;;  %v68_v1 = vld [vmem:[#allocation5] ss:$0 sm:$0xff]  ;;  %s53_s0 = int_to_ptr.vmem [resolvable:$true] %s52_s0 }
   0xd   :  { %v45_v2 = vadd.f32 %v68_v1, %v40_v0 }
   0xf   :  { %46 = vst [vmem:[#allocation7] sm:$0xff] %v45_v2 }
  0x10   :  { %57 = dma.vmem_to_hbm [thread:$0]  %s53_s0, 128, %s55_s22, [#allocation4]  }
  0x11   :  { %145 = dma.done.wait [#allocation4], 128  }
  0x12   :  { %146 = vsyncadd [#allocation4], 4294967168 }
  0x13   :  { %62 = vsyncpa [#allocation3], 1 }
  0x14   :  { %63 = vsyncpa [#allocation6], 1 }
  0x15   :  { %64 = vsyncpa [#allocation4], 1 }

</bundles_post_ra>
